<compile_context>
chip_gen: v7x
topology: tpu7x:2x2x1
jax: 0.10.0
libtpu: 0.0.40
codegen_flags: <defaults>
</compile_context>

<pallas_src>
import math
import functools

import jax
import jax.numpy as jnp
from jax.experimental import pallas as pl
from jax.experimental.pallas import tpu as pltpu


def _mha_kernel(q_ref, h_ref, wq_ref, wk_ref, wv_ref, wo_ref, o_ref, *,
                norm_factor, n_heads, key_dim, val_dim, compute_dtype):
    Bt, Nq, D = q_ref.shape
    G = h_ref.shape[1]
    H, Kd, Vd = n_heads, key_dim, val_dim
    E = o_ref.shape[-1]

    cast = ((lambda x: x.astype(compute_dtype)) if compute_dtype is not None
            else (lambda x: x))

    q2 = cast(q_ref[...]).reshape(Bt * Nq, D)
    h2 = cast(h_ref[...]).reshape(Bt * G, D)
    wq = cast(wq_ref[...])
    wk = cast(wk_ref[...])
    wv = cast(wv_ref[...])
    wo = cast(wo_ref[...])

    # Fused projections: one full-width (D x H*Kd / H*Vd) MXU matmul each.
    Qf = jnp.dot(q2, wq, preferred_element_type=jnp.float32).reshape(Bt, Nq, H * Kd)
    Kf = jnp.dot(h2, wk, preferred_element_type=jnp.float32).reshape(Bt, G, H * Kd)
    Vf = jnp.dot(h2, wv, preferred_element_type=jnp.float32).reshape(Bt, G, H * Vd)

    # Per-head attention.  H is small & static -> unrolled Python loop with
    # static lane slices; einsum contracts last axes so K is never transposed.
    # TODO(synk): optional `mask` argument (set -inf before softmax, zero after)
    # is not implemented; the reference forward with mask=None is reproduced.
    head_outs = []
    for hh in range(H):
        Qb = Qf[:, :, hh * Kd:(hh + 1) * Kd]          # (Bt, Nq, Kd)
        Kb = Kf[:, :, hh * Kd:(hh + 1) * Kd]          # (Bt, G, Kd)
        Vb = Vf[:, :, hh * Vd:(hh + 1) * Vd]          # (Bt, G, Vd)

        compat = norm_factor * jnp.einsum(
            'bqk,bgk->bqg', cast(Qb), cast(Kb),
            preferred_element_type=jnp.float32)        # (Bt, Nq, G)
        m = jnp.max(compat, axis=-1, keepdims=True)
        e = jnp.exp(compat - m)                        # softmax math stays f32
        attn = e * pl.reciprocal(jnp.sum(e, axis=-1, keepdims=True), approx=True)

        head_outs.append(jnp.einsum(
            'bqg,bgv->bqv', cast(attn), cast(Vb),
            preferred_element_type=jnp.float32))       # (Bt, Nq, Vd)

    heads = jnp.concatenate(head_outs, axis=-1)        # (Bt, Nq, H*Vd), head-major
    out = jnp.dot(cast(heads.reshape(Bt * Nq, H * Vd)), wo,
                  preferred_element_type=jnp.float32)  # (Bt*Nq, E)
    o_ref[...] = out.reshape(Bt, Nq, E).astype(o_ref.dtype)


def multi_head_attention(q, h, W_query, W_key, W_val, W_out, *,
                         batch_tile=None, compute_dtype=None):
    """Pallas forward pass matching the PyTorch MultiHeadAttention.forward (mask=None).

    compute_dtype: optionally cast MXU operands (e.g. jnp.bfloat16 on v6e/v7x);
    default None keeps the exact-f32 matmul path.
    """
    B, Nq, D = q.shape
    _, G, _ = h.shape
    H, _, Kd = W_query.shape
    Vd = W_val.shape[-1]
    E = W_out.shape[-1]
    norm_factor = 1.0 / math.sqrt(Kd)

    # Fuse per-head projection weights into full-width matrices (head-major on
    # the fused axis, matching W_out.view(-1, embed_dim) in the reference).
    wq_f = jnp.transpose(W_query, (1, 0, 2)).reshape(D, H * Kd)
    wk_f = jnp.transpose(W_key, (1, 0, 2)).reshape(D, H * Kd)
    wv_f = jnp.transpose(W_val, (1, 0, 2)).reshape(D, H * Vd)
    wo_f = W_out.reshape(H * Vd, E)

    # Batch-tile: biggest divisor of B whose double-buffered q/h/out blocks stay
    # well inside v7x's 64 MiB VMEM (conservative 8 MiB budget; weights resident
    # on top are only a few hundred KB even at embed_dim=128).
    if batch_tile is None:
        itemsize = jnp.dtype(q.dtype).itemsize
        per_b = 2 * (Nq * D + G * D + Nq * E) * itemsize
        budget = 8 << 20
        batch_tile = max(1, min(B, budget // max(per_b, 1)))
        while B % batch_tile:
            batch_tile -= 1
    Bt = batch_tile

    kernel = functools.partial(_mha_kernel, norm_factor=norm_factor,
                               n_heads=H, key_dim=Kd, val_dim=Vd,
                               compute_dtype=compute_dtype)

    flops = 2 * B * (Nq * D * H * Kd + G * D * H * (Kd + Vd)
                     + H * Nq * G * (Kd + Vd) + Nq * H * Vd * E)
    bytes_accessed = int((q.size + h.size + wq_f.size + wk_f.size + wv_f.size
                          + wo_f.size + B * Nq * E) * jnp.dtype(q.dtype).itemsize)
    cost = pl.CostEstimate(flops=flops,
                           transcendentals=B * H * Nq * G,
                           bytes_accessed=bytes_accessed)

    return pl.pallas_call(
        kernel,
        out_shape=jax.ShapeDtypeStruct((B, Nq, E), q.dtype),
        grid_spec=pltpu.PrefetchScalarGridSpec(
            num_scalar_prefetch=0,
            grid=(B // Bt,),
            in_specs=[
                pl.BlockSpec((Bt, Nq, D), lambda i: (i, 0, 0)),    # q (batch-tiled)
                pl.BlockSpec((Bt, G, D), lambda i: (i, 0, 0)),     # h (batch-tiled)
                pl.BlockSpec((D, H * Kd), lambda i: (0, 0)),       # fused W_query (resident)
                pl.BlockSpec((D, H * Kd), lambda i: (0, 0)),       # fused W_key   (resident)
                pl.BlockSpec((D, H * Vd), lambda i: (0, 0)),       # fused W_val   (resident)
                pl.BlockSpec((H * Vd, E), lambda i: (0, 0)),       # fused W_out   (resident)
            ],
            out_specs=pl.BlockSpec((Bt, Nq, E), lambda i: (i, 0, 0)),
        ),
        compiler_params=pltpu.CompilerParams(
            dimension_semantics=("parallel",)),
        cost_estimate=cost,
    )(q, h, wq_f, wk_f, wv_f, wo_f)


def _reference(q, h, W_query, W_key, W_val, W_out):
    """Pure-JAX reference mirroring the PyTorch code (mask=None)."""
    Kd = W_query.shape[-1]
    norm = 1.0 / math.sqrt(Kd)
    Q = jnp.einsum('bqd,hdk->hbqk', q, W_query)
    K = jnp.einsum('bgd,hdk->hbgk', h, W_key)
    V = jnp.einsum('bgd,hdv->hbgv', h, W_val)
    compat = norm * jnp.einsum('hbqk,hbgk->hbqg', Q, K)
    attn = jax.nn.softmax(compat, axis=-1)
    heads = jnp.einsum('hbqg,hbgv->hbqv', attn, V)
    out = jnp.einsum('hbqv,hve->bqe', heads, W_out)
    return out


if __name__ == "__main__":
    # Module config (small, consistent with the forward pass):
    n_heads, input_dim, embed_dim = 4, 32, 32
    key_dim = val_dim = embed_dim // n_heads  # 8
    batch_size, n_query = 2, 8
    graph_size = n_query  # self-attention: h = q

    key = jax.random.PRNGKey(0)
    k_q, k_wq, k_wk, k_wv, k_wo = jax.random.split(key, 5)

    # Deterministic parameter init matching nn.Module init: uniform(-stdv, stdv),
    # stdv = 1/sqrt(param.size(-1)).
    def init_w(k, shape):
        stdv = 1.0 / math.sqrt(shape[-1])
        return jax.random.uniform(k, shape, jnp.float32, -stdv, stdv)

    W_query = init_w(k_wq, (n_heads, input_dim, key_dim))
    W_key = init_w(k_wk, (n_heads, input_dim, key_dim))
    W_val = init_w(k_wv, (n_heads, input_dim, val_dim))
    W_out = init_w(k_wo, (n_heads, val_dim, embed_dim))

    q = jax.random.normal(k_q, (batch_size, n_query, input_dim), jnp.float32)
    h = q  # forward(q, h=None) -> h = q

    out = multi_head_attention(q, h, W_query, W_key, W_val, W_out)
    out = jax.block_until_ready(out)

    ref = _reference(q, h, W_query, W_key, W_val, W_out)
    assert out.shape == (batch_size, n_query, embed_dim)
    # Tolerance loosened slightly vs. exact-f32: the softmax denominator uses the
    # EUP approximate reciprocal (pl.reciprocal(..., approx=True)).
    assert jnp.allclose(out, ref, atol=1e-2, rtol=1e-2), "mismatch vs reference"

    print("KERNEL_OK")
</pallas_src>

<mosaic_0001>
module attributes {stable_mosaic.version = 11 : i64} {
  func.func @_mha_kernel(%arg0: i32, %arg1: memref<2x8x32xf32, #tpu.memory_space<vmem>>, %arg2: memref<2x8x32xf32, #tpu.memory_space<vmem>>, %arg3: memref<32x32xf32, #tpu.memory_space<vmem>>, %arg4: memref<32x32xf32, #tpu.memory_space<vmem>>, %arg5: memref<32x32xf32, #tpu.memory_space<vmem>>, %arg6: memref<32x32xf32, #tpu.memory_space<vmem>>, %arg7: memref<2x8x32xf32, #tpu.memory_space<vmem>>) attributes {dimension_semantics = [#tpu.dimension_semantics<parallel>], iteration_bounds = array<i64: 1>, scalar_prefetch = 0 : i64, scratch_operands = 0 : i64, tpu.core_type = #tpu.core_type<tc>, window_params = [{transform_indices = @transform_0, window_bounds = array<i64: 2, 8, 32>}, {transform_indices = @transform_1, window_bounds = array<i64: 2, 8, 32>}, {pipeline_mode = #tpu.pipeline_mode<synchronous>, transform_indices = @transform_2, window_bounds = array<i64: 32, 32>}, {pipeline_mode = #tpu.pipeline_mode<synchronous>, transform_indices = @transform_3, window_bounds = array<i64: 32, 32>}, {pipeline_mode = #tpu.pipeline_mode<synchronous>, transform_indices = @transform_4, window_bounds = array<i64: 32, 32>}, {pipeline_mode = #tpu.pipeline_mode<synchronous>, transform_indices = @transform_5, window_bounds = array<i64: 32, 32>}, {transform_indices = @transform_6, window_bounds = array<i64: 2, 8, 32>}]} {
    %c0 = arith.constant 0 : index
    %c0_0 = arith.constant 0 : index
    %c0_1 = arith.constant 0 : index
    %0 = vector.load %arg1[%c0, %c0_0, %c0_1] : memref<2x8x32xf32, #tpu.memory_space<vmem>>, vector<2x8x32xf32>
    %1 = vector.shape_cast %0 : vector<2x8x32xf32> to vector<16x32xf32>
    %c0_2 = arith.constant 0 : index
    %c0_3 = arith.constant 0 : index
    %c0_4 = arith.constant 0 : index
    %2 = vector.load %arg2[%c0_2, %c0_3, %c0_4] : memref<2x8x32xf32, #tpu.memory_space<vmem>>, vector<2x8x32xf32>
    %3 = vector.shape_cast %2 : vector<2x8x32xf32> to vector<16x32xf32>
    %c0_5 = arith.constant 0 : index
    %c0_6 = arith.constant 0 : index
    %4 = vector.load %arg3[%c0_5, %c0_6] : memref<32x32xf32, #tpu.memory_space<vmem>>, vector<32x32xf32>
    %c0_7 = arith.constant 0 : index
    %c0_8 = arith.constant 0 : index
    %5 = vector.load %arg4[%c0_7, %c0_8] : memref<32x32xf32, #tpu.memory_space<vmem>>, vector<32x32xf32>
    %c0_9 = arith.constant 0 : index
    %c0_10 = arith.constant 0 : index
    %6 = vector.load %arg5[%c0_9, %c0_10] : memref<32x32xf32, #tpu.memory_space<vmem>>, vector<32x32xf32>
    %c0_11 = arith.constant 0 : index
    %c0_12 = arith.constant 0 : index
    %7 = vector.load %arg6[%c0_11, %c0_12] : memref<32x32xf32, #tpu.memory_space<vmem>>, vector<32x32xf32>
    %cst = arith.constant dense<0.000000e+00> : vector<16x32xf32>
    %8 = tpu.matmul %1, %4, %cst {dimension_numbers = #tpu.dot_dimension_numbers<[1], [0], [0], [1], [0, 0, 1, 1], [], []>} : vector<16x32xf32>, vector<32x32xf32>, vector<16x32xf32> -> vector<16x32xf32>
    %9 = vector.shape_cast %8 : vector<16x32xf32> to vector<2x8x32xf32>
    %cst_13 = arith.constant dense<0.000000e+00> : vector<16x32xf32>
    %10 = tpu.matmul %3, %5, %cst_13 {dimension_numbers = #tpu.dot_dimension_numbers<[1], [0], [0], [1], [0, 0, 1, 1], [], []>} : vector<16x32xf32>, vector<32x32xf32>, vector<16x32xf32> -> vector<16x32xf32>
    %11 = vector.shape_cast %10 : vector<16x32xf32> to vector<2x8x32xf32>
    %cst_14 = arith.constant dense<0.000000e+00> : vector<16x32xf32>
    %12 = tpu.matmul %3, %6, %cst_14 {dimension_numbers = #tpu.dot_dimension_numbers<[1], [0], [0], [1], [0, 0, 1, 1], [], []>} : vector<16x32xf32>, vector<32x32xf32>, vector<16x32xf32> -> vector<16x32xf32>
    %13 = vector.shape_cast %12 : vector<16x32xf32> to vector<2x8x32xf32>
    %14 = vector.extract_strided_slice %9 {offsets = [0, 0, 0], sizes = [2, 8, 8], strides = [1, 1, 1]} : vector<2x8x32xf32> to vector<2x8x8xf32>
    %15 = vector.extract_strided_slice %11 {offsets = [0, 0, 0], sizes = [2, 8, 8], strides = [1, 1, 1]} : vector<2x8x32xf32> to vector<2x8x8xf32>
    %16 = vector.extract_strided_slice %13 {offsets = [0, 0, 0], sizes = [2, 8, 8], strides = [1, 1, 1]} : vector<2x8x32xf32> to vector<2x8x8xf32>
    "tpu.trace_start"() <{level = 10 : i32, message = "bqk,bgk->bqg"}> : () -> ()
    %cst_15 = arith.constant dense<0.000000e+00> : vector<2x8x8xf32>
    %17 = tpu.matmul %14, %15, %cst_15 {dimension_numbers = #tpu.dot_dimension_numbers<[2], [2], [1], [1], [0, 0, 0, 1, 1, 1], [0], [0]>} : vector<2x8x8xf32>, vector<2x8x8xf32>, vector<2x8x8xf32> -> vector<2x8x8xf32>
    "tpu.trace_stop"() : () -> ()
    %cst_16 = arith.constant 0.353553385 : f32
    %18 = vector.broadcast %cst_16 : f32 to vector<2x8x8xf32>
    %19 = arith.mulf %18, %17 : vector<2x8x8xf32>
    %cst_17 = arith.constant dense<0xFF800000> : vector<2x8xf32>
    %20 = vector.multi_reduction <maximumf>, %19, %cst_17 [2] : vector<2x8x8xf32> to vector<2x8xf32>
    %21 = vector.shape_cast %20 : vector<2x8xf32> to vector<2x8x1xf32>
    %22 = vector.broadcast %21 : vector<2x8x1xf32> to vector<2x8x8xf32>
    %23 = arith.subf %19, %22 : vector<2x8x8xf32>
    %24 = math.exp %23 : vector<2x8x8xf32>
    %cst_18 = arith.constant dense<0.000000e+00> : vector<2x8xf32>
    %25 = vector.multi_reduction <add>, %24, %cst_18 [2] : vector<2x8x8xf32> to vector<2x8xf32>
    %26 = vector.shape_cast %25 : vector<2x8xf32> to vector<2x8x1xf32>
    %27 = tpu.reciprocal %26 {approx = true} : vector<2x8x1xf32> -> vector<2x8x1xf32>
    %28 = vector.broadcast %27 : vector<2x8x1xf32> to vector<2x8x8xf32>
    %29 = arith.mulf %24, %28 : vector<2x8x8xf32>
    "tpu.trace_start"() <{level = 10 : i32, message = "bqg,bgv->bqv"}> : () -> ()
    %cst_19 = arith.constant dense<0.000000e+00> : vector<2x8x8xf32>
    %30 = tpu.matmul %29, %16, %cst_19 {dimension_numbers = #tpu.dot_dimension_numbers<[2], [1], [1], [2], [0, 0, 0, 1, 1, 2], [0], [0]>} : vector<2x8x8xf32>, vector<2x8x8xf32>, vector<2x8x8xf32> -> vector<2x8x8xf32>
    "tpu.trace_stop"() : () -> ()
    %31 = vector.extract_strided_slice %9 {offsets = [0, 0, 8], sizes = [2, 8, 8], strides = [1, 1, 1]} : vector<2x8x32xf32> to vector<2x8x8xf32>
    %32 = vector.extract_strided_slice %11 {offsets = [0, 0, 8], sizes = [2, 8, 8], strides = [1, 1, 1]} : vector<2x8x32xf32> to vector<2x8x8xf32>
    %33 = vector.extract_strided_slice %13 {offsets = [0, 0, 8], sizes = [2, 8, 8], strides = [1, 1, 1]} : vector<2x8x32xf32> to vector<2x8x8xf32>
    "tpu.trace_start"() <{level = 10 : i32, message = "bqk,bgk->bqg"}> : () -> ()
    %cst_20 = arith.constant dense<0.000000e+00> : vector<2x8x8xf32>
    %34 = tpu.matmul %31, %32, %cst_20 {dimension_numbers = #tpu.dot_dimension_numbers<[2], [2], [1], [1], [0, 0, 0, 1, 1, 1], [0], [0]>} : vector<2x8x8xf32>, vector<2x8x8xf32>, vector<2x8x8xf32> -> vector<2x8x8xf32>
    "tpu.trace_stop"() : () -> ()
    %cst_21 = arith.constant 0.353553385 : f32
    %35 = vector.broadcast %cst_21 : f32 to vector<2x8x8xf32>
    %36 = arith.mulf %35, %34 : vector<2x8x8xf32>
    %cst_22 = arith.constant dense<0xFF800000> : vector<2x8xf32>
    %37 = vector.multi_reduction <maximumf>, %36, %cst_22 [2] : vector<2x8x8xf32> to vector<2x8xf32>
    %38 = vector.shape_cast %37 : vector<2x8xf32> to vector<2x8x1xf32>
    %39 = vector.broadcast %38 : vector<2x8x1xf32> to vector<2x8x8xf32>
    %40 = arith.subf %36, %39 : vector<2x8x8xf32>
    %41 = math.exp %40 : vector<2x8x8xf32>
    %cst_23 = arith.constant dense<0.000000e+00> : vector<2x8xf32>
    %42 = vector.multi_reduction <add>, %41, %cst_23 [2] : vector<2x8x8xf32> to vector<2x8xf32>
    %43 = vector.shape_cast %42 : vector<2x8xf32> to vector<2x8x1xf32>
    %44 = tpu.reciprocal %43 {approx = true} : vector<2x8x1xf32> -> vector<2x8x1xf32>
    %45 = vector.broadcast %44 : vector<2x8x1xf32> to vector<2x8x8xf32>
    %46 = arith.mulf %41, %45 : vector<2x8x8xf32>
    "tpu.trace_start"() <{level = 10 : i32, message = "bqg,bgv->bqv"}> : () -> ()
    %cst_24 = arith.constant dense<0.000000e+00> : vector<2x8x8xf32>
    %47 = tpu.matmul %46, %33, %cst_24 {dimension_numbers = #tpu.dot_dimension_numbers<[2], [1], [1], [2], [0, 0, 0, 1, 1, 2], [0], [0]>} : vector<2x8x8xf32>, vector<2x8x8xf32>, vector<2x8x8xf32> -> vector<2x8x8xf32>
    "tpu.trace_stop"() : () -> ()
    %48 = vector.extract_strided_slice %9 {offsets = [0, 0, 16], sizes = [2, 8, 8], strides = [1, 1, 1]} : vector<2x8x32xf32> to vector<2x8x8xf32>
    %49 = vector.extract_strided_slice %11 {offsets = [0, 0, 16], sizes = [2, 8, 8], strides = [1, 1, 1]} : vector<2x8x32xf32> to vector<2x8x8xf32>
    %50 = vector.extract_strided_slice %13 {offsets = [0, 0, 16], sizes = [2, 8, 8], strides = [1, 1, 1]} : vector<2x8x32xf32> to vector<2x8x8xf32>
    "tpu.trace_start"() <{level = 10 : i32, message = "bqk,bgk->bqg"}> : () -> ()
    %cst_25 = arith.constant dense<0.000000e+00> : vector<2x8x8xf32>
    %51 = tpu.matmul %48, %49, %cst_25 {dimension_numbers = #tpu.dot_dimension_numbers<[2], [2], [1], [1], [0, 0, 0, 1, 1, 1], [0], [0]>} : vector<2x8x8xf32>, vector<2x8x8xf32>, vector<2x8x8xf32> -> vector<2x8x8xf32>
    "tpu.trace_stop"() : () -> ()
    %cst_26 = arith.constant 0.353553385 : f32
    %52 = vector.broadcast %cst_26 : f32 to vector<2x8x8xf32>
    %53 = arith.mulf %52, %51 : vector<2x8x8xf32>
    %cst_27 = arith.constant dense<0xFF800000> : vector<2x8xf32>
    %54 = vector.multi_reduction <maximumf>, %53, %cst_27 [2] : vector<2x8x8xf32> to vector<2x8xf32>
    %55 = vector.shape_cast %54 : vector<2x8xf32> to vector<2x8x1xf32>
    %56 = vector.broadcast %55 : vector<2x8x1xf32> to vector<2x8x8xf32>
    %57 = arith.subf %53, %56 : vector<2x8x8xf32>
    %58 = math.exp %57 : vector<2x8x8xf32>
    %cst_28 = arith.constant dense<0.000000e+00> : vector<2x8xf32>
    %59 = vector.multi_reduction <add>, %58, %cst_28 [2] : vector<2x8x8xf32> to vector<2x8xf32>
    %60 = vector.shape_cast %59 : vector<2x8xf32> to vector<2x8x1xf32>
    %61 = tpu.reciprocal %60 {approx = true} : vector<2x8x1xf32> -> vector<2x8x1xf32>
    %62 = vector.broadcast %61 : vector<2x8x1xf32> to vector<2x8x8xf32>
    %63 = arith.mulf %58, %62 : vector<2x8x8xf32>
    "tpu.trace_start"() <{level = 10 : i32, message = "bqg,bgv->bqv"}> : () -> ()
    %cst_29 = arith.constant dense<0.000000e+00> : vector<2x8x8xf32>
    %64 = tpu.matmul %63, %50, %cst_29 {dimension_numbers = #tpu.dot_dimension_numbers<[2], [1], [1], [2], [0, 0, 0, 1, 1, 2], [0], [0]>} : vector<2x8x8xf32>, vector<2x8x8xf32>, vector<2x8x8xf32> -> vector<2x8x8xf32>
    "tpu.trace_stop"() : () -> ()
    %65 = vector.extract_strided_slice %9 {offsets = [0, 0, 24], sizes = [2, 8, 8], strides = [1, 1, 1]} : vector<2x8x32xf32> to vector<2x8x8xf32>
    %66 = vector.extract_strided_slice %11 {offsets = [0, 0, 24], sizes = [2, 8, 8], strides = [1, 1, 1]} : vector<2x8x32xf32> to vector<2x8x8xf32>
    %67 = vector.extract_strided_slice %13 {offsets = [0, 0, 24], sizes = [2, 8, 8], strides = [1, 1, 1]} : vector<2x8x32xf32> to vector<2x8x8xf32>
    "tpu.trace_start"() <{level = 10 : i32, message = "bqk,bgk->bqg"}> : () -> ()
    %cst_30 = arith.constant dense<0.000000e+00> : vector<2x8x8xf32>
    %68 = tpu.matmul %65, %66, %cst_30 {dimension_numbers = #tpu.dot_dimension_numbers<[2], [2], [1], [1], [0, 0, 0, 1, 1, 1], [0], [0]>} : vector<2x8x8xf32>, vector<2x8x8xf32>, vector<2x8x8xf32> -> vector<2x8x8xf32>
    "tpu.trace_stop"() : () -> ()
    %cst_31 = arith.constant 0.353553385 : f32
    %69 = vector.broadcast %cst_31 : f32 to vector<2x8x8xf32>
    %70 = arith.mulf %69, %68 : vector<2x8x8xf32>
    %cst_32 = arith.constant dense<0xFF800000> : vector<2x8xf32>
    %71 = vector.multi_reduction <maximumf>, %70, %cst_32 [2] : vector<2x8x8xf32> to vector<2x8xf32>
    %72 = vector.shape_cast %71 : vector<2x8xf32> to vector<2x8x1xf32>
    %73 = vector.broadcast %72 : vector<2x8x1xf32> to vector<2x8x8xf32>
    %74 = arith.subf %70, %73 : vector<2x8x8xf32>
    %75 = math.exp %74 : vector<2x8x8xf32>
    %cst_33 = arith.constant dense<0.000000e+00> : vector<2x8xf32>
    %76 = vector.multi_reduction <add>, %75, %cst_33 [2] : vector<2x8x8xf32> to vector<2x8xf32>
    %77 = vector.shape_cast %76 : vector<2x8xf32> to vector<2x8x1xf32>
    %78 = tpu.reciprocal %77 {approx = true} : vector<2x8x1xf32> -> vector<2x8x1xf32>
    %79 = vector.broadcast %78 : vector<2x8x1xf32> to vector<2x8x8xf32>
    %80 = arith.mulf %75, %79 : vector<2x8x8xf32>
    "tpu.trace_start"() <{level = 10 : i32, message = "bqg,bgv->bqv"}> : () -> ()
    %cst_34 = arith.constant dense<0.000000e+00> : vector<2x8x8xf32>
    %81 = tpu.matmul %80, %67, %cst_34 {dimension_numbers = #tpu.dot_dimension_numbers<[2], [1], [1], [2], [0, 0, 0, 1, 1, 2], [0], [0]>} : vector<2x8x8xf32>, vector<2x8x8xf32>, vector<2x8x8xf32> -> vector<2x8x8xf32>
    "tpu.trace_stop"() : () -> ()
    %82 = tpu.concatenate %30, %47, %64, %81 in 2 : vector<2x8x8xf32>, vector<2x8x8xf32>, vector<2x8x8xf32>, vector<2x8x8xf32> -> vector<2x8x32xf32>
    %83 = vector.shape_cast %82 : vector<2x8x32xf32> to vector<16x32xf32>
    %cst_35 = arith.constant dense<0.000000e+00> : vector<16x32xf32>
    %84 = tpu.matmul %83, %7, %cst_35 {dimension_numbers = #tpu.dot_dimension_numbers<[1], [0], [0], [1], [0, 0, 1, 1], [], []>} : vector<16x32xf32>, vector<32x32xf32>, vector<16x32xf32> -> vector<16x32xf32>
    %85 = vector.shape_cast %84 : vector<16x32xf32> to vector<2x8x32xf32>
    %c0_36 = arith.constant 0 : index
    %c0_37 = arith.constant 0 : index
    %c0_38 = arith.constant 0 : index
    %86 = vector.load %arg7[%c0_36, %c0_37, %c0_38] : memref<2x8x32xf32, #tpu.memory_space<vmem>>, vector<2x8x32xf32>
    tpu.vector_store %arg7[%c0_36, %c0_37, %c0_38], %85 {strides = array<i32>} : memref<2x8x32xf32, #tpu.memory_space<vmem>>, vector<2x8x32xf32>,
    return
  }
  func.func @transform_0(%arg0: i32) -> (i32, i32, i32) {
    %c0_i32 = arith.constant 0 : i32
    %c0_i32_0 = arith.constant 0 : i32
    %c0_i32_1 = arith.constant 0 : i32
    return %arg0, %c0_i32, %c0_i32_0 : i32, i32, i32
  }
  func.func @transform_1(%arg0: i32) -> (i32, i32, i32) {
    %c0_i32 = arith.constant 0 : i32
    %c0_i32_0 = arith.constant 0 : i32
    %c0_i32_1 = arith.constant 0 : i32
    return %arg0, %c0_i32, %c0_i32_0 : i32, i32, i32
  }
  func.func @transform_2(%arg0: i32) -> (i32, i32) {
    %c0_i32 = arith.constant 0 : i32
    %c0_i32_0 = arith.constant 0 : i32
    %c0_i32_1 = arith.constant 0 : i32
    return %c0_i32, %c0_i32_0 : i32, i32
  }
  func.func @transform_3(%arg0: i32) -> (i32, i32) {
    %c0_i32 = arith.constant 0 : i32
    %c0_i32_0 = arith.constant 0 : i32
    %c0_i32_1 = arith.constant 0 : i32
    return %c0_i32, %c0_i32_0 : i32, i32
  }
  func.func @transform_4(%arg0: i32) -> (i32, i32) {
    %c0_i32 = arith.constant 0 : i32
    %c0_i32_0 = arith.constant 0 : i32
    %c0_i32_1 = arith.constant 0 : i32
    return %c0_i32, %c0_i32_0 : i32, i32
  }
  func.func @transform_5(%arg0: i32) -> (i32, i32) {
    %c0_i32 = arith.constant 0 : i32
    %c0_i32_0 = arith.constant 0 : i32
    %c0_i32_1 = arith.constant 0 : i32
    return %c0_i32, %c0_i32_0 : i32, i32
  }
  func.func @transform_6(%arg0: i32) -> (i32, i32, i32) {
    %c0_i32 = arith.constant 0 : i32
    %c0_i32_0 = arith.constant 0 : i32
    %c0_i32_1 = arith.constant 0 : i32
    return %arg0, %c0_i32, %c0_i32_0 : i32, i32, i32
  }
}

</mosaic_0001>

<bundles_post_ra>
// kernel: tpu_custom_call.1
= control target key start
LH: loop header
LB: loop body
LE: loop exit
PB: predicated region body
PF: predicated region fallthrough
CT: control target
= control target key end

     0   :  { %11 = vsyncpa [#allocation3], 0  ;;  %s2621_s0 = inlined_call_operand.hbm [shape: f32[2,8,32], index: 0, kind: input, shape index: {}]   ;;  %s2622_s1 = inlined_call_operand.hbm [shape: f32[2,8,32], index: 1, kind: input, shape index: {}]   ;;  %s2623_s2 = inlined_call_operand.hbm [shape: f32[32,32], index: 2, kind: input, shape index: {}]   ;;  %s2624_s3 = inlined_call_operand.hbm [shape: f32[32,32], index: 3, kind: input, shape index: {}]   ;;  %s2625_s4 = inlined_call_operand.hbm [shape: f32[32,32], index: 4, kind: input, shape index: {}]   ;;  %s2626_s5 = inlined_call_operand.hbm [shape: f32[32,32], index: 5, kind: input, shape index: {}]   ;;  %s2627_s6 = inlined_call_operand.hbm [shape: f32[2,8,32], index: 6, kind: output, shape index: {}]  }
   0x1   :  { %12 = vsyncpa [#allocation6], 0 }
   0x2   :  { %13 = vsyncpa [#allocation9], 0 }
   0x3   :  { %14 = vsyncpa [#allocation12], 0 }
   0x4   :  { %15 = vsyncpa [#allocation4], 0  ;;  %s2276_s21 = smov [#allocation5]   ;;  %s2277_s23 = smov [#allocation8]  }
   0x5   :  { %s33_s22 = sshll.u32 %s2276_s21, 4  ;;  %s57_s24 = sshll.u32 %s2277_s23, 4  ;;  %s34_s22 = int_to_ptr.vmem [resolvable:$true] %s33_s22  ;;  %s2327_s24 = int_to_ptr.vmem [resolvable:$true] %s57_s24 }
   0x6   :  { %s2112_s27 = scalar_lea.hbm %s2622_s1, 256 }
   0x7   :  { %p2113_p0 = scmp.ne.s32.totalorder %s2622_s1, %s2112_s27  ;;  %p2116_p1 = scmp.lt.u32.totalorder %s2112_s27, %s2622_s1 }
   0x9   :  { %p2118_p2 = pnand %p2116_p1, %p2113_p0 }
   0xb   :  { %2121 = shalt.err (!%p2118_p2)
}
   0xc   :  { %s2122_s8 = scalar_lea.vmem %s34_s22, 256  ;;  %p2127_p4 = scmp.lt.s32.totalorder %s34_s22, %s34_s22 }
   0xd   :  { %p2123_p3 = scmp.ne.s32.totalorder %s34_s22, %s2122_s8  ;;  %p2128_p5 = scmp.lt.s32.totalorder %s2122_s8, %s2122_s8 }
   0xf   :  { %p2129_p6 = por %p2128_p5, %p2127_p4 }
  0x11   :  { %p2130_p7 = pnand %p2129_p6, %p2123_p3 }
  0x13   :  { %2133 = shalt.err (!%p2130_p7)
}
  0x14   :  { %s2278_s9 = smov 128   ;;  %s2279_s10 = smov 8  }
  0x15   :  { %39 = dma.hbm_to_vmem [thread:$0]  %s2622_s1, 256, %s34_s22, [#allocation6], %s2278_s9, %s2278_s9, %s2279_s10  }
  0x16   :  { %s2134_s15 = scalar_lea.hbm %s2624_s3, 512 }
  0x17   :  { %p2135_p8 = scmp.ne.s32.totalorder %s2624_s3, %s2134_s15  ;;  %p2138_p9 = scmp.lt.u32.totalorder %s2134_s15, %s2624_s3 }
  0x19   :  { %p2140_p10 = pnand %p2138_p9, %p2135_p8 }
  0x1b   :  { %2143 = shalt.err (!%p2140_p10)
}
  0x1c   :  { %s2144_s20 = scalar_lea.vmem %s2327_s24, 512  ;;  %p2149_p12 = scmp.lt.s32.totalorder %s2327_s24, %s2327_s24 }
  0x1d   :  { %p2145_p11 = scmp.ne.s32.totalorder %s2327_s24, %s2144_s20  ;;  %p2150_p13 = scmp.lt.s32.totalorder %s2144_s20, %s2144_s20 }
  0x1f   :  { %p2151_p0 = por %p2150_p13, %p2149_p12 }
  0x21   :  { %p2152_p1 = pnand %p2151_p0, %p2145_p11 }
  0x23   :  { %2155 = shalt.err (!%p2152_p1)
}
  0x24   :  { %63 = dma.hbm_to_vmem [thread:$0]  %s2624_s3, 512, %s2327_s24, [#allocation9], %s2278_s9, %s2278_s9, %s2279_s10  }
  0x25   :  { %s2280_s22 = smov [#allocation2]   ;;  %s2281_s25 = smov [#allocation7]  }
  0x26   :  { %s21_s23 = sshll.u32 %s2280_s22, 4  ;;  %s45_s26 = sshll.u32 %s2281_s25, 4  ;;  %s22_s23 = int_to_ptr.vmem [resolvable:$true] %s21_s23  ;;  %s2364_s26 = int_to_ptr.vmem [resolvable:$true] %s45_s26 }
  0x27   :  { %s2156_s29 = scalar_lea.hbm %s2621_s0, 256 }
  0x28   :  { %p2157_p2 = scmp.ne.s32.totalorder %s2621_s0, %s2156_s29  ;;  %p2160_p3 = scmp.lt.u32.totalorder %s2156_s29, %s2621_s0 }
  0x2a   :  { %p2162_p4 = pnand %p2160_p3, %p2157_p2 }
  0x2c   :  { %2165 = shalt.err (!%p2162_p4)
}
  0x2d   :  { %s2166_s3 = scalar_lea.vmem %s22_s23, 256  ;;  %p2171_p6 = scmp.lt.s32.totalorder %s22_s23, %s22_s23 }
  0x2e   :  { %p2167_p5 = scmp.ne.s32.totalorder %s22_s23, %s2166_s3  ;;  %p2172_p7 = scmp.lt.s32.totalorder %s2166_s3, %s2166_s3 }
  0x30   :  { %p2173_p8 = por %p2172_p7, %p2171_p6 }
  0x32   :  { %p2174_p9 = pnand %p2173_p8, %p2167_p5 }
  0x34   :  { %2177 = shalt.err (!%p2174_p9)
}
  0x35   :  { %27 = dma.hbm_to_vmem [thread:$0]  %s2621_s0, 256, %s22_s23, [#allocation3], %s2278_s9, %s2278_s9, %s2279_s10  }
  0x36   :  { %s2178_s15 = scalar_lea.hbm %s2623_s2, 512 }
  0x37   :  { %p2179_p10 = scmp.ne.s32.totalorder %s2623_s2, %s2178_s15  ;;  %p2182_p11 = scmp.lt.u32.totalorder %s2178_s15, %s2623_s2 }
  0x39   :  { %p2184_p12 = pnand %p2182_p11, %p2179_p10 }
  0x3b   :  { %2187 = shalt.err (!%p2184_p12)
}
  0x3c   :  { %s2188_s20 = scalar_lea.vmem %s2364_s26, 512  ;;  %p2193_p0 = scmp.lt.s32.totalorder %s2364_s26, %s2364_s26 }
  0x3d   :  { %p2189_p13 = scmp.ne.s32.totalorder %s2364_s26, %s2188_s20  ;;  %p2194_p1 = scmp.lt.s32.totalorder %s2188_s20, %s2188_s20 }
  0x3f   :  { %p2195_p2 = por %p2194_p1, %p2193_p0 }
  0x41   :  { %p2196_p3 = pnand %p2195_p2, %p2189_p13 }
  0x43   :  { %2199 = shalt.err (!%p2196_p3)
}
  0x44   :  { %51 = dma.hbm_to_vmem [thread:$0]  %s2623_s2, 512, %s2364_s26, [#allocation6], %s2278_s9, %s2278_s9, %s2279_s10  }
  0x45   :  { %s2282_s21 = smov [#allocation10]   ;;  %s2283_s23 = smov [#allocation11]  }
  0x46   :  { %s69_s22 = sshll.u32 %s2282_s21, 4  ;;  %s81_s25 = sshll.u32 %s2283_s23, 4  ;;  %s70_s22 = int_to_ptr.vmem [resolvable:$true] %s69_s22  ;;  %s2401_s25 = int_to_ptr.vmem [resolvable:$true] %s81_s25 }
  0x47   :  { %s2200_s29 = scalar_lea.hbm %s2625_s4, 512 }
  0x48   :  { %p2201_p4 = scmp.ne.s32.totalorder %s2625_s4, %s2200_s29  ;;  %p2204_p5 = scmp.lt.u32.totalorder %s2200_s29, %s2625_s4 }
  0x4a   :  { %p2206_p6 = pnand %p2204_p5, %p2201_p4 }
  0x4c   :  { %2209 = shalt.err (!%p2206_p6)
}
  0x4d   :  { %s2210_s2 = scalar_lea.vmem %s70_s22, 512  ;;  %p2215_p8 = scmp.lt.s32.totalorder %s70_s22, %s70_s22 }
  0x4e   :  { %p2211_p7 = scmp.ne.s32.totalorder %s70_s22, %s2210_s2  ;;  %p2216_p9 = scmp.lt.s32.totalorder %s2210_s2, %s2210_s2 }
  0x50   :  { %p2217_p10 = por %p2216_p9, %p2215_p8 }
  0x52   :  { %p2218_p11 = pnand %p2217_p10, %p2211_p7 }
  0x54   :  { %2221 = shalt.err (!%p2218_p11)
}
  0x55   :  { %75 = dma.hbm_to_vmem [thread:$0]  %s2625_s4, 512, %s70_s22, [#allocation9], %s2278_s9, %s2278_s9, %s2279_s10  }
  0x56   :  { %s2222_s13 = scalar_lea.hbm %s2626_s5, 512 }
  0x57   :  { %p2223_p12 = scmp.ne.s32.totalorder %s2626_s5, %s2222_s13  ;;  %p2226_p13 = scmp.lt.u32.totalorder %s2222_s13, %s2626_s5 }
  0x59   :  { %p2228_p0 = pnand %p2226_p13, %p2223_p12 }
  0x5b   :  { %2231 = shalt.err (!%p2228_p0)
}
  0x5c   :  { %s2232_s18 = scalar_lea.vmem %s2401_s25, 512  ;;  %p2237_p2 = scmp.lt.s32.totalorder %s2401_s25, %s2401_s25 }
  0x5d   :  { %p2233_p1 = scmp.ne.s32.totalorder %s2401_s25, %s2232_s18  ;;  %p2238_p3 = scmp.lt.s32.totalorder %s2232_s18, %s2232_s18 }
  0x5f   :  { %p2239_p4 = por %p2238_p3, %p2237_p2 }
  0x61   :  { %p2240_p5 = pnand %p2239_p4, %p2233_p1 }
  0x63   :  { %2243 = shalt.err (!%p2240_p5)
}
  0x64   :  { %87 = dma.hbm_to_vmem [thread:$0]  %s2626_s5, 512, %s2401_s25, [#allocation12], %s2278_s9, %s2278_s9, %s2279_s10  }
  0x65   :  { %2266 = dma.done.wait [#allocation3], 256  }
  0x66   :  { %2267 = vsyncadd [#allocation3], 4294967040 }
  0x67   :  { %2268 = dma.done.wait [#allocation6], 768  }
  0x68   :  { %2269 = vsyncadd [#allocation6], 4294966528 }
  0x69   :  { %2270 = dma.done.wait [#allocation9], 1024  }
  0x6a   :  { %2271 = vsyncadd [#allocation9], 4294966272 }
  0x6b   :  { %2272 = dma.done.wait [#allocation12], 512  }
  0x6c   :  { %2273 = vsyncadd [#allocation12], 4294966784  ;;  %v114_v0 = vld [vmem:[#allocation8] sm:$0xff]  ;;  %v115_v1 = vld [vmem:[#allocation8 + $0x8] sm:$0xff]  ;;  %vm126_vm0 = vcmask 261120   ;;  %v2284_v16 = vmov 0.0  }
  0x6d   :  { %v110_v2 = vld [vmem:[#allocation7] sm:$0xff]  ;;  %v2040_v3 = vpack.c.bf16 %v115_v1, %v114_v0  ;;  %v111_v4 = vld [vmem:[#allocation7 + $0x8] sm:$0xff]  ;;  %v116_v5 = vld [vmem:[#allocation8 + $0x10] sm:$0xff]  ;;  %vm2285_vm1 = vmmov 0   ;;  %vm364_vm2 = vcmask 64512   ;;  %s2286_s5 = smov 120  }
  0x6e   :  { %v117_v6 = vld [vmem:[#allocation8 + $0x18] sm:$0xff]  ;;  %v2032_v7 = vpack.c.bf16 %v111_v4, %v110_v2  ;;  %v112_v9 = vld [vmem:[#allocation7 + $0x10] sm:$0xff]  ;;  %v106_v13 = vld [vmem:[#allocation2] sm:$0xff]  ;;  %s2287_s20 = smov 112   ;;  %s2288_s0 = smov 104   ;;  %vm1714_vm3 = vcmask 195584  }
  0x6f   :  { %v2044_v8 = vpack.c.bf16 %v117_v6, %v116_v5  ;;  %v113_v10 = vld [vmem:[#allocation7 + $0x18] sm:$0xff]  ;;  %v108_v11 = vld [vmem:[#allocation5] sm:$0xff]  ;;  %2041 = vmatprep.subr.bf16.mxu1 %v2040_v3  ;;  %1916 = vmatprep.mubr.msk.f32.mxu0 %vm126_vm0, %v106_v13  ;;  %v107_v15 = vld [vmem:[#allocation2 + $0x8] sm:$0xff]  ;;  %s2289_s1 = smov 16   ;;  %s2290_s21 = smov 24   ;;  %vm1711_vm4 = vcmask 130048  }
  0x70   :  { %v2036_v12 = vpack.c.bf16 %v113_v10, %v112_v9  ;;  %1927 = vmatprep.mubr.msk.f32.mxu1 %vm126_vm0, %v108_v11  ;;  %2043 = vmatpush3.bf16.msra.mxu1 %v2040_v3  ;;  %v109_v14 = vld [vmem:[#allocation5 + $0x8] sm:$0xff]  ;;  %v118_v21 = vld [vmem:[#allocation10] sm:$0xff]  ;;  %v119_v22 = vld [vmem:[#allocation10 + $0x8] sm:$0xff]  ;;  %s2291_s22 = smov [#allocation13]  }
  0x71   :  { %2033 = vmatprep.subr.bf16.mxu0 %v2032_v7  ;;  %2045 = vmatprep.subr.bf16.mxu1 %v2044_v8  ;;  %v120_v23 = vld [vmem:[#allocation10 + $0x10] sm:$0xff]  ;;  %v2048_v24 = vpack.c.bf16 %v119_v22, %v118_v21  ;;  %v121_v25 = vld [vmem:[#allocation10 + $0x18] sm:$0xff]  ;;  %s1805_s23 = sshll.u32 %s2291_s22, 4  ;;  %s1806_s23 = int_to_ptr.vmem [resolvable:$true] %s1805_s23 }
  0x72   :  { %2035 = vmatpush3.bf16.msra.mxu0 %v2032_v7  ;;  %v2052_v26 = vpack.c.bf16 %v121_v25, %v120_v23  ;;  %s2244_s25 = scalar_lea.vmem %s1806_s23, 256  ;;  %p2249_p7 = scmp.lt.s32.totalorder %s1806_s23, %s1806_s23 }
  0x73   :  { %2037 = vmatprep.subr.bf16.mxu0 %v2036_v12  ;;  %p2245_p6 = scmp.ne.s32.totalorder %s1806_s23, %s2244_s25  ;;  %p2250_p8 = scmp.lt.s32.totalorder %s2244_s25, %s2244_s25 }
  0x74   :  { %2047 = vmatpush3.bf16.msra.mxu1 %v2044_v8 }
  0x75   :  { %1941 = vmatprep.subr.mxu1 %v2284_v16  ;;  %p2251_p9 = por %p2250_p8, %p2249_p7 }
  0x76   :  { %2039 = vmatpush3.bf16.msra.mxu0 %v2036_v12 }
  0x77   :  { %1928 = vmatmul.mubr.msk.f32.vlgmr.msra.gmra.mrb[0].mxu1 %vm126_vm0, %v109_v14  ;;  %2049 = vmatprep.subr.bf16.mxu0 %v2048_v24  ;;  %p2252_p10 = pnand %p2251_p9, %p2245_p6 }
  0x78   :  { %1943 = vmatprep.mubr.msk.f32.mxu1 %vm2285_vm1, %v2284_v16 }
  0x79   :  { %1917 = vmatmul.mubr.msk.f32.vlgmr.msra.gmra.mrb[0].mxu0 %vm126_vm0, %v107_v15 }
  0x7a   :  { %1938 = vmatprep.mubr.msk.f32.mxu0 %vm126_vm0, %v108_v11  ;;  %2051 = vmatpush3.bf16.msra.mxu0 %v2048_v24 }
  0x7b   :  { %2053 = vmatprep.subr.bf16.mxu0 %v2052_v26 }
  0x7e   :  { %2055 = vmatpush3.bf16.msra.mxu0 %v2052_v26 }
  0x7f   :  { %1961 = vmatprep.subr.mxu0 %v2284_v16 }
  0x81   :  { %1939 = vmatmul.mubr.msk.f32.vlgmr.msra.gmra.mrb[2].mxu0 %vm126_vm0, %v109_v14 }
  0x82   :  { %1963 = vmatprep.mubr.msk.f32.mxu0 %vm2285_vm1, %v2284_v16 }
 0x14a   :  { %v2446_v17 = vpop.f32.mrb[0].mxu1 }
 0x14b   :  { %767 = vrot.lane.b32.xlu1 %v2446_v17, %s2286_s5  ;;  %v2450_v18 = vpop.f32.mrb[1].mxu1 }
 0x14c   :  { %v2452_v19 = vpop.f32.mrb[0].mxu0  ;;  %1942 = vmatpush3.xpose.msk.msra.mxu1 %vm364_vm2, %v2450_v18 }
 0x14d   :  { %v2456_v20 = vpop.f32.mrb[1].mxu0  ;;  %1946 = vmatprep.subr.mxu1 %v2284_v16 }
 0x14f   :  { %687 = vrot.lane.b32.xlu1 %v2456_v20, %s2286_s5  ;;  %1944 = vmatmul.mubr.msk.f32.vlgmr.msra.gmra.mrb[2].mxu1 %vm364_vm2, %v2456_v20 }
 0x150   :  { %1947 = vmatpush3.xpose.msk.msra.mxu1 %vm364_vm2, %v2446_v17  ;;  %1948 = vmatprep.mubr.msk.f32.mxu1 %vm2285_vm1, %v2284_v16 }
 0x151   :  { %1951 = vmatprep.subr.mxu1 %v2284_v16 }
 0x153   :  { %1949 = vmatmul.mubr.msk.f32.vlgmr.msra.gmra.mrb[4].mxu1 %vm364_vm2, %v2452_v19 }
 0x154   :  { %1953 = vmatprep.mubr.msk.f32.mxu1 %vm2285_vm1, %v2284_v16  ;;  %v2489_v48 = vpop.f32.mrb[2].mxu0 }
 0x155   :  { %v2491_v49 = vpop.f32.mrb[3].mxu0 }
 0x156   :  { %1952 = vmatpush3.msra.mxu1 %v2491_v49 }
 0x157   :  { %1956 = vmatprep.subr.mxu1 %v2284_v16 }
 0x1bd   :  { %v768_v39 = vpop.permute.xlu1 %767 }
 0x1c1   :  { %v688_v43 = vpop.permute.xlu1 %687 }
 0x222   :  { %v437_v27 = vpop.f32.mrb[2].mxu1 }
 0x223   :  { %v517_v28 = vmul.f32 0.35355338, %v437_v27  ;;  %v1945_v29 = vpop.f32.mrb[3].mxu1 }
 0x225   :  { %v519_v30 = vsel %vm364_vm2, %v517_v28, -inf }
 0x226   :  { %520 = vmax.xlane.f32.xlu0 %v519_v30  ;;  %v513_v31 = vpop.f32.mrb[4].mxu1 }
 0x227   :  { %v518_v32 = vmul.f32 0.35355338, %v513_v31  ;;  %v1950_v33 = vpop.f32.mrb[5].mxu1 }
 0x229   :  { %v522_v34 = vsel %vm364_vm2, %v518_v32, -inf }
 0x22a   :  { %523 = vmax.xlane.f32.xlu0 %v522_v34 }
 0x240   :  { %689 = vrot.lane.b32.xlu0 %v2450_v18, %s2286_s5 }
 0x2b3   :  { %v521_v35 = vpop.xlane.xlu0 %520 }
 0x2b4   :  { %v525_v36 = vsub.f32 %v517_v28, %v521_v35 }
 0x2b6   :  { %v527_v37 = vmul.f32 1.442695, %v525_v36 }
 0x2b7   :  { %v524_v38 = vpop.xlane.xlu0 %523 }
 0x2b8   :  { %2080 = vpow2.f32 %v527_v37  ;;  %v526_v40 = vsub.f32 %v518_v32, %v524_v38 }
 0x2ba   :  { %v529_v41 = vmul.f32 1.442695, %v526_v40 }
 0x2bb   :  { %v690_v42 = vpop.permute.xlu0 %689 }
 0x2bc   :  { %2082 = vpow2.f32 %v529_v41  ;;  %1962 = vmatpush3.xpose.msk.msra.mxu0 %vm364_vm2, %v690_v42 }
 0x2bd   :  { %1971 = vmatprep.subr.mxu0 %v2284_v16 }
 0x2bf   :  { %1964 = vmatmul.mubr.msk.f32.vlgmr.msra.gmra.mrb[4].mxu0 %vm364_vm2, %v688_v43 }
 0x2c0   :  { %1973 = vmatprep.mubr.msk.f32.mxu0 %vm2285_vm1, %v2284_v16 }
 0x2c2   :  { %v2081_v44 = vpop.eup %2080 }
 0x2c3   :  { %v531_v45 = vsel %vm364_vm2, %v2081_v44, 0.0 }
 0x2c4   :  { %532 = vadd.xlane.f32.xlu1 %v531_v45 }
 0x2c6   :  { %v2083_v46 = vpop.eup %2082 }
 0x2c7   :  { %v534_v47 = vsel %vm364_vm2, %v2083_v46, 0.0 }
 0x2c8   :  { %535 = vadd.xlane.f32.xlu1 %v534_v47 }
 0x2d9   :  { %765 = vrot.lane.b32.xlu1 %v2452_v19, %s2286_s5 }
 0x351   :  { %v533_v50 = vpop.xlane.xlu1 %532 }
 0x352   :  { %2084 = vrcp.f32 %v533_v50 }
 0x355   :  { %v536_v51 = vpop.xlane.xlu1 %535 }
 0x356   :  { %2086 = vrcp.f32 %v536_v51 }
 0x359   :  { %v766_v56 = vpop.permute.xlu1 %765 }
 0x35c   :  { %v2085_v52 = vpop.eup %2084 }
 0x35d   :  { %v539_v53 = vmul.f32 %v2085_v52, %v2081_v44 }
 0x35f   :  { %1954 = vmatmul.mubr.msk.f32.vlgmr.msra.gmra.mrb[6].mxu1 %vm364_vm2, %v539_v53 }
 0x360   :  { %v2087_v54 = vpop.eup %2086  ;;  %1957 = vmatpush3.msra.mxu1 %v2489_v48  ;;  %1958 = vmatprep.mubr.msk.f32.mxu1 %vm2285_vm1, %v2284_v16 }
 0x361   :  { %v540_v55 = vmul.f32 %v2087_v54, %v2083_v46  ;;  %1966 = vmatprep.subr.mxu1 %v2284_v16 }
 0x363   :  { %1959 = vmatmul.mubr.msk.f32.vlgmr.msra.gmra.mrb[8].mxu1 %vm364_vm2, %v540_v55 }
 0x364   :  { %1968 = vmatprep.mubr.msk.f32.mxu1 %vm2285_vm1, %v2284_v16 }
 0x367   :  { %1967 = vmatpush3.xpose.msk.msra.mxu1 %vm364_vm2, %v768_v39 }
 0x368   :  { %1976 = vmatprep.subr.mxu1 %v2284_v16 }
 0x36a   :  { %1969 = vmatmul.mubr.msk.f32.vlgmr.msra.gmra.mrb[10].mxu1 %vm364_vm2, %v766_v56 }
 0x36b   :  { %1978 = vmatprep.mubr.msk.f32.mxu1 %vm2285_vm1, %v2284_v16 }
 0x392   :  { %v761_v57 = vpop.f32.mrb[4].mxu0 }
 0x393   :  { %v843_v58 = vmul.f32 0.35355338, %v761_v57  ;;  %v1965_v59 = vpop.f32.mrb[5].mxu0 }
 0x395   :  { %v845_v60 = vsel %vm364_vm2, %v843_v58, -inf }
 0x396   :  { %846 = vmax.xlane.f32.xlu0 %v845_v60 }
 0x423   :  { %v847_v61 = vpop.xlane.xlu0 %846 }
 0x424   :  { %v851_v62 = vsub.f32 %v843_v58, %v847_v61 }
 0x426   :  { %v853_v63 = vmul.f32 1.442695, %v851_v62 }
 0x428   :  { %2088 = vpow2.f32 %v853_v63 }
 0x432   :  { %v2089_v0 = vpop.eup %2088  ;;  %v2509_v1 = vpop.f32.mrb[6].mxu1 }
 0x433   :  { %v1955_v2 = vpop.f32.mrb[7].mxu1  ;;  %v857_v3 = vsel %vm364_vm2, %v2089_v0, 0.0 }
 0x434   :  { %858 = vadd.xlane.f32.xlu0 %v857_v3 }
 0x436   :  { %v2512_v4 = vpop.f32.mrb[8].mxu1 }
 0x437   :  { %v1960_v5 = vpop.f32.mrb[9].mxu1 }
 0x43d   :  { %v839_v6 = vpop.f32.mrb[10].mxu1 }
 0x43e   :  { %v844_v7 = vmul.f32 0.35355338, %v839_v6  ;;  %v1970_v8 = vpop.f32.mrb[11].mxu1 }
 0x440   :  { %v848_v9 = vsel %vm364_vm2, %v844_v7, -inf }
 0x441   :  { %849 = vmax.xlane.f32.xlu1 %v848_v9 }
 0x44a   :  { %868 = vrot.lane.b32.xlu0 %v2491_v49, %s2286_s5 }
 0x452   :  { %945 = vrot.lane.b32.xlu1 %v2489_v48, %s2286_s5 }
 0x456   :  { %1023 = vrot.lane.b32.xlu1 %v2450_v18, %s2287_s20 }
 0x45a   :  { %1101 = vrot.lane.b32.xlu1 %v2446_v17, %s2287_s20 }
 0x45e   :  { %1099 = vrot.lane.b32.xlu1 %v2452_v19, %s2287_s20 }
 0x4c1   :  { %v859_v10 = vpop.xlane.xlu0 %858 }
 0x4c2   :  { %2090 = vrcp.f32 %v859_v10 }
 0x4c5   :  { %v869_v11 = vpop.permute.xlu0 %868 }
 0x4c6   :  { %1972 = vmatpush3.msra.mxu0 %v869_v11 }
 0x4c7   :  { %1981 = vmatprep.subr.mxu0 %v2284_v16 }
 0x4cc   :  { %v2091_v12 = vpop.eup %2090 }
 0x4cd   :  { %v865_v13 = vmul.f32 %v2091_v12, %v2089_v0 }
 0x4ce   :  { %v850_v14 = vpop.xlane.xlu1 %849 }
 0x4cf   :  { %v852_v15 = vsub.f32 %v844_v7, %v850_v14  ;;  %1974 = vmatmul.mubr.msk.f32.vlgmr.msra.gmra.mrb[6].mxu0 %vm364_vm2, %v865_v13 }
 0x4d0   :  { %1983 = vmatprep.mubr.msk.f32.mxu0 %vm2285_vm1, %v2284_v16 }
 0x4d1   :  { %v855_v21 = vmul.f32 1.442695, %v852_v15 }
 0x4d2   :  { %v946_v22 = vpop.permute.xlu1 %945 }
 0x4d3   :  { %2092 = vpow2.f32 %v855_v21  ;;  %1977 = vmatpush3.msra.mxu1 %v946_v22 }
 0x4d4   :  { %1986 = vmatprep.subr.mxu1 %v2284_v16 }
 0x4d6   :  { %v1024_v23 = vpop.permute.xlu1 %1023 }
 0x4d7   :  { %1982 = vmatpush3.xpose.msk.msra.mxu0 %vm364_vm2, %v1024_v23 }
 0x4d8   :  { %1991 = vmatprep.subr.mxu0 %v2284_v16 }
 0x4da   :  { %v1102_v29 = vpop.permute.xlu1 %1101 }
 0x4dd   :  { %v2093_v24 = vpop.eup %2092 }
 0x4de   :  { %v860_v25 = vsel %vm364_vm2, %v2093_v24, 0.0  ;;  %v1100_v31 = vpop.permute.xlu1 %1099 }
 0x4df   :  { %861 = vadd.xlane.f32.xlu0 %v860_v25 }
 0x4f5   :  { %1021 = vrot.lane.b32.xlu0 %v2456_v20, %s2287_s20 }
 0x56c   :  { %v862_v26 = vpop.xlane.xlu0 %861 }
 0x56d   :  { %2094 = vrcp.f32 %v862_v26 }
 0x570   :  { %v1022_v27 = vpop.permute.xlu0 %1021 }
 0x571   :  { %1984 = vmatmul.mubr.msk.f32.vlgmr.msra.gmra.mrb[8].mxu0 %vm364_vm2, %v1022_v27 }
 0x572   :  { %1993 = vmatprep.mubr.msk.f32.mxu0 %vm2285_vm1, %v2284_v16 }
 0x577   :  { %v2095_v28 = vpop.eup %2094 }
 0x578   :  { %v866_v30 = vmul.f32 %v2095_v28, %v2093_v24 }
 0x57a   :  { %1979 = vmatmul.mubr.msk.f32.vlgmr.msra.gmra.mrb[12].mxu1 %vm364_vm2, %v866_v30 }
 0x57b   :  { %1987 = vmatpush3.xpose.msk.msra.mxu1 %vm364_vm2, %v1102_v29  ;;  %1988 = vmatprep.mubr.msk.f32.mxu1 %vm2285_vm1, %v2284_v16 }
 0x57c   :  { %1996 = vmatprep.subr.mxu1 %v2284_v16 }
 0x57e   :  { %1989 = vmatmul.mubr.msk.f32.vlgmr.msra.gmra.mrb[14].mxu1 %vm364_vm2, %v1100_v31 }
 0x57f   :  { %1998 = vmatprep.mubr.msk.f32.mxu1 %vm2285_vm1, %v2284_v16 }
 0x5a2   :  { %v2546_v32 = vpop.f32.mrb[6].mxu0 }
 0x5a3   :  { %v1975_v33 = vpop.f32.mrb[7].mxu0 }
 0x644   :  { %v1095_v34 = vpop.f32.mrb[8].mxu0 }
 0x645   :  { %v1177_v35 = vmul.f32 0.35355338, %v1095_v34  ;;  %v1985_v36 = vpop.f32.mrb[9].mxu0 }
 0x646   :  { %v123_v36 = vld [vmem:[#allocation11 + $0x8] sm:$0xff] }
 0x647   :  { %v1179_v37 = vsel %vm364_vm2, %v1177_v35, -inf }
 0x648   :  { %1180 = vmax.xlane.f32.xlu0 %v1179_v37 }
 0x64d   :  { %v2549_v38 = vpop.f32.mrb[12].mxu1 }
 0x64e   :  { %v1980_v39 = vpop.f32.mrb[13].mxu1 }
 0x651   :  { %v1173_v40 = vpop.f32.mrb[14].mxu1 }
 0x652   :  { %v1178_v41 = vmul.f32 0.35355338, %v1173_v40  ;;  %v1990_v42 = vpop.f32.mrb[15].mxu1 }
 0x654   :  { %v1182_v43 = vsel %vm364_vm2, %v1178_v41, -inf }
 0x655   :  { %1183 = vmax.xlane.f32.xlu1 %v1182_v43 }
 0x666   :  { %1277 = vrot.lane.b32.xlu1 %v2489_v48, %s2287_s20 }
 0x66a   :  { %1355 = vrot.lane.b32.xlu1 %v2450_v18, %s2288_s0 }
 0x66e   :  { %1433 = vrot.lane.b32.xlu1 %v2446_v17, %s2288_s0 }
 0x672   :  { %1431 = vrot.lane.b32.xlu1 %v2452_v19, %s2288_s0 }
 0x6d5   :  { %v1181_v44 = vpop.xlane.xlu0 %1180 }
 0x6d6   :  { %v1185_v45 = vsub.f32 %v1177_v35, %v1181_v44  ;;  %v122_v35 = vld [vmem:[#allocation11] sm:$0xff] }
 0x6d7   :  { %v2056_v37 = vpack.c.bf16 %v123_v36, %v122_v35 }
 0x6d8   :  { %v1187_v46 = vmul.f32 1.442695, %v1185_v45 }
 0x6da   :  { %2096 = vpow2.f32 %v1187_v46 }
 0x6e2   :  { %v1184_v47 = vpop.xlane.xlu1 %1183 }
 0x6e3   :  { %v1186_v17 = vsub.f32 %v1178_v41, %v1184_v47 }
 0x6e4   :  { %v2097_v50 = vpop.eup %2096 }
 0x6e5   :  { %v1191_v51 = vsel %vm364_vm2, %v2097_v50, 0.0  ;;  %v1189_v18 = vmul.f32 1.442695, %v1186_v17 }
 0x6e6   :  { %1192 = vadd.xlane.f32.xlu0 %v1191_v51  ;;  %v1278_v52 = vpop.permute.xlu1 %1277 }
 0x6e7   :  { %1997 = vmatpush3.msra.mxu1 %v1278_v52  ;;  %2098 = vpow2.f32 %v1189_v18 }
 0x6e8   :  { %2006 = vmatprep.subr.mxu1 %v2284_v16 }
 0x6ea   :  { %v1356_v58 = vpop.permute.xlu1 %1355 }
 0x6ee   :  { %v1434_v61 = vpop.permute.xlu1 %1433 }
 0x6f1   :  { %v2099_v19 = vpop.eup %2098 }
 0x6f2   :  { %v1194_v53 = vsel %vm364_vm2, %v2099_v19, 0.0  ;;  %v1432_v63 = vpop.permute.xlu1 %1431 }
 0x6fc   :  { %1201 = vrot.lane.b32.xlu0 %v2491_v49, %s2287_s20 }
 0x71b   :  { %1195 = vadd.xlane.f32.xlu0 %v1194_v53 }
 0x731   :  { %1353 = vrot.lane.b32.xlu0 %v2456_v20, %s2288_s0 }
 0x773   :  { %v1193_v54 = vpop.xlane.xlu0 %1192 }
 0x774   :  { %2100 = vrcp.f32 %v1193_v54 }
 0x777   :  { %v1202_v55 = vpop.permute.xlu0 %1201 }
 0x778   :  { %1992 = vmatpush3.msra.mxu0 %v1202_v55 }
 0x779   :  { %2001 = vmatprep.subr.mxu0 %v2284_v16 }
 0x77e   :  { %v2101_v56 = vpop.eup %2100 }
 0x77f   :  { %v1199_v57 = vmul.f32 %v2101_v56, %v2097_v50 }
 0x781   :  { %1994 = vmatmul.mubr.msk.f32.vlgmr.msra.gmra.mrb[10].mxu0 %vm364_vm2, %v1199_v57 }
 0x782   :  { %2002 = vmatpush3.xpose.msk.msra.mxu0 %vm364_vm2, %v1356_v58  ;;  %2003 = vmatprep.mubr.msk.f32.mxu0 %vm2285_vm1, %v2284_v16 }
 0x783   :  { %2011 = vmatprep.subr.mxu0 %v2284_v16 }
 0x7a8   :  { %v1196_v59 = vpop.xlane.xlu0 %1195 }
 0x7a9   :  { %2102 = vrcp.f32 %v1196_v59 }
 0x7ac   :  { %v1354_v20 = vpop.permute.xlu0 %1353 }
 0x7ad   :  { %2004 = vmatmul.mubr.msk.f32.vlgmr.msra.gmra.mrb[12].mxu0 %vm364_vm2, %v1354_v20 }
 0x7ae   :  { %2013 = vmatprep.mubr.msk.f32.mxu0 %vm2285_vm1, %v2284_v16 }
 0x7b3   :  { %v2103_v60 = vpop.eup %2102 }
 0x7b4   :  { %v1200_v62 = vmul.f32 %v2103_v60, %v2099_v19 }
 0x7b6   :  { %1999 = vmatmul.mubr.msk.f32.vlgmr.msra.gmra.mrb[16].mxu1 %vm364_vm2, %v1200_v62 }
 0x7b7   :  { %2007 = vmatpush3.xpose.msk.msra.mxu1 %vm364_vm2, %v1434_v61  ;;  %2008 = vmatprep.mubr.msk.f32.mxu1 %vm2285_vm1, %v2284_v16 }
 0x7b8   :  { %2016 = vmatprep.subr.mxu1 %v2284_v16 }
 0x7ba   :  { %2009 = vmatmul.mubr.msk.f32.vlgmr.msra.gmra.mrb[18].mxu1 %vm364_vm2, %v1432_v63 }
 0x7bb   :  { %2018 = vmatprep.mubr.msk.f32.mxu1 %vm2285_vm1, %v2284_v16 }
 0x854   :  { %v1273_v0 = vpop.f32.mrb[10].mxu0 }
 0x855   :  { %v1995_v2 = vpop.f32.mrb[11].mxu0 }
 0x880   :  { %v1427_v3 = vpop.f32.mrb[12].mxu0 }
 0x881   :  { %v1509_v5 = vmul.f32 0.35355338, %v1427_v3  ;;  %v2005_v6 = vpop.f32.mrb[13].mxu0 }
 0x883   :  { %v1511_v7 = vsel %vm364_vm2, %v1509_v5, -inf }
 0x884   :  { %1512 = vmax.xlane.f32.xlu0 %v1511_v7 }
 0x889   :  { %v1349_v8 = vpop.f32.mrb[16].mxu1 }
 0x88a   :  { %v2000_v9 = vpop.f32.mrb[17].mxu1 }
 0x88d   :  { %v1505_v10 = vpop.f32.mrb[18].mxu1 }
 0x88e   :  { %v1510_v11 = vmul.f32 0.35355338, %v1505_v10  ;;  %v2010_v12 = vpop.f32.mrb[19].mxu1 }
 0x890   :  { %v1514_v13 = vsel %vm364_vm2, %v1510_v11, -inf }
 0x891   :  { %1515 = vmax.xlane.f32.xlu1 %v1514_v13 }
 0x8a2   :  { %1609 = vrot.lane.b32.xlu1 %v2489_v48, %s2288_s0 }
 0x8a6   :  { %1687 = vrot.lane.b32.xlu1 %v2546_v32, %s2279_s10 }
 0x8aa   :  { %1689 = vrot.lane.b32.xlu1 %v2549_v38, %s2279_s10  ;;  %v124_v38 = vld [vmem:[#allocation11 + $0x10] sm:$0xff] }
 0x8ae   :  { %1697 = vrot.lane.b32.xlu1 %v1349_v8, %s2289_s1 }
 0x911   :  { %v1513_v16 = vpop.xlane.xlu0 %1512 }
 0x912   :  { %v1517_v14 = vsub.f32 %v1509_v5, %v1513_v16 }
 0x914   :  { %v1519_v15 = vmul.f32 1.442695, %v1517_v14 }
 0x916   :  { %2104 = vpow2.f32 %v1519_v15 }
 0x91e   :  { %v1516_v21 = vpop.xlane.xlu1 %1515 }
 0x91f   :  { %v1518_v22 = vsub.f32 %v1510_v11, %v1516_v21 }
 0x920   :  { %v2105_v23 = vpop.eup %2104 }
 0x921   :  { %v1521_v24 = vmul.f32 1.442695, %v1518_v22  ;;  %v1523_v25 = vsel %vm364_vm2, %v2105_v23, 0.0 }
 0x922   :  { %1524 = vadd.xlane.f32.xlu0 %v1523_v25  ;;  %v1610_v48 = vpop.permute.xlu1 %1609 }
 0x923   :  { %2106 = vpow2.f32 %v1521_v24  ;;  %2017 = vmatpush3.msra.mxu1 %v1610_v48 }
 0x926   :  { %v1688_v44 = vpop.permute.xlu1 %1687 }
 0x927   :  { %v1709_v47 = vsel %vm364_vm2, %v2509_v1, %v1688_v44 }
 0x92a   :  { %v1690_v46 = vpop.permute.xlu1 %1689 }
 0x92b   :  { %v1710_v18 = vsel %vm364_vm2, %v2512_v4, %v1690_v46 }
 0x92d   :  { %v2107_v26 = vpop.eup %2106 }
 0x92e   :  { %v1526_v27 = vsel %vm364_vm2, %v2107_v26, 0.0  ;;  %v1698_v17 = vpop.permute.xlu1 %1697 }
 0x92f   :  { %1527 = vadd.xlane.f32.xlu0 %v1526_v27  ;;  %v1713_v19 = vsel %vm1711_vm4, %v1710_v18, %v1698_v17 }
 0x945   :  { %1533 = vrot.lane.b32.xlu0 %v2491_v49, %s2288_s0  ;;  %v125_v49 = vld [vmem:[#allocation11 + $0x18] sm:$0xff] }
 0x946   :  { %v2060_v39 = vpack.c.bf16 %v125_v49, %v124_v38 }
 0x949   :  { %1695 = vrot.lane.b32.xlu0 %v1273_v0, %s2289_s1 }
 0x9af   :  { %v1525_v28 = vpop.xlane.xlu0 %1524 }
 0x9b0   :  { %2108 = vrcp.f32 %v1525_v28 }
 0x9ba   :  { %v2109_v30 = vpop.eup %2108 }
 0x9bb   :  { %v1531_v31 = vmul.f32 %v2109_v30, %v2105_v23 }
 0x9bc   :  { %v1528_v29 = vpop.xlane.xlu0 %1527 }
 0x9bd   :  { %2110 = vrcp.f32 %v1528_v29 }
 0x9c0   :  { %v1534_v32 = vpop.permute.xlu0 %1533 }
 0x9c1   :  { %2012 = vmatpush3.msra.mxu0 %v1534_v32 }
 0x9c2   :  { %2014 = vmatmul.mubr.msk.f32.vlgmr.msra.gmra.mrb[14].mxu0 %vm364_vm2, %v1531_v31  ;;  %2057 = vmatprep.subr.bf16.mxu0 %v2056_v37 }
 0x9c3   :  { %2059 = vmatpush3.bf16.msra.mxu0 %v2056_v37 }
 0x9c4   :  { %2061 = vmatprep.subr.bf16.mxu0 %v2060_v39  ;;  %v1696_v45 = vpop.permute.xlu0 %1695 }
 0x9c5   :  { %v1712_v50 = vsel %vm1711_vm4, %v1709_v47, %v1696_v45 }
 0x9c7   :  { %v2111_v33 = vpop.eup %2110  ;;  %2063 = vmatpush3.bf16.msra.mxu0 %v2060_v39 }
 0x9c8   :  { %v1532_v34 = vmul.f32 %v2111_v33, %v2107_v26 }
 0x9ca   :  { %2019 = vmatmul.mubr.msk.f32.vlgmr.msra.gmra.mrb[20].mxu1 %vm364_vm2, %v1532_v34 }
 0xa95   :  { %v1605_v40 = vpop.f32.mrb[14].mxu0 }
 0xa96   :  { %1703 = vrot.lane.b32.xlu0 %v1605_v40, %s2290_s21  ;;  %v2015_v41 = vpop.f32.mrb[15].mxu0 }
 0xa9d   :  { %v1681_v42 = vpop.f32.mrb[20].mxu1 }
 0xa9e   :  { %1705 = vrot.lane.b32.xlu1 %v1681_v42, %s2290_s21  ;;  %v2020_v43 = vpop.f32.mrb[21].mxu1 }
 0xb08   :  { %v1704_v51 = vpop.permute.xlu0 %1703 }
 0xb09   :  { %v1715_v52 = vsel %vm1714_vm3, %v1712_v50, %v1704_v51 }
 0xb0a   :  { %2029 = vmatprep.mubr.msk.f32.mxu0 %vm126_vm0, %v1715_v52 }
 0xb10   :  { %v1706_v53 = vpop.permute.xlu1 %1705 }
 0xb11   :  { %v1716_v54 = vsel %vm1714_vm3, %v1713_v19, %v1706_v53 }
 0xb12   :  { %2030 = vmatmul.mubr.msk.f32.vlgmr.msra.gmra.mrb[16].mxu0 %vm126_vm0, %v1716_v54 }
 0xbe5   :  { %v2031_v55 = vpop.f32.mrb[16].mxu0 }
 0xbe6   :  { %1799 = vst.msk [vmem:[#allocation13 + $0x8] sm:$0xff] %vm126_vm0, %v2031_v55  ;;  %v1789_v1 = vpop.f32.mrb[17].mxu0 }
 0xbe7   :  { %1798 = vst.msk [vmem:[#allocation13] sm:$0xff] %vm126_vm0, %v1789_v1 }
 0xbe8   :  { %2255 = shalt.err (!%p2252_p10)
}
 0xbe9   :  { %s2256_s29 = scalar_lea.hbm %s2627_s6, 256 }
 0xbea   :  { %p2257_p11 = scmp.ne.s32.totalorder %s2627_s6, %s2256_s29  ;;  %p2260_p12 = scmp.lt.u32.totalorder %s2256_s29, %s2627_s6 }
 0xbec   :  { %p2262_p13 = pnand %p2260_p12, %p2257_p11 }
 0xbee   :  { %2265 = shalt.err (!%p2262_p13)
}
 0xbef   :  { %1811 = dma.vmem_to_hbm [thread:$0]  %s1806_s23, 256, %s2627_s6, [#allocation4], %s2278_s9, %s2278_s9, %s2279_s10  }
 0xbf0   :  { %2274 = dma.done.wait [#allocation4], 256  }
 0xbf1   :  { %2275 = vsyncadd [#allocation4], 4294967040 }
 0xbf2   :  { %1815 = vsyncpa [#allocation3], 1 }
 0xbf3   :  { %1816 = vsyncpa [#allocation6], 1 }
 0xbf4   :  { %1817 = vsyncpa [#allocation9], 1 }
 0xbf5   :  { %1818 = vsyncpa [#allocation12], 1 }
 0xbf6   :  { %1819 = vsyncpa [#allocation4], 1 }

</bundles_post_ra>
